<compile_context>
chip_gen: v7x
topology: tpu7x:2x2x1
jax: 0.10.0
libtpu: 0.0.40
codegen_flags: <defaults>
</compile_context>

<pallas_src>
import jax
import jax.numpy as jnp
from jax.experimental import pallas as pl
from jax.experimental.pallas import tpu as pltpu


def decoder_kernel(x_ref, w1_ref, b1_ref, w2_ref, b2_ref, o_ref):
    # First linear + ReLU (MXU matmul, VPU elementwise, f32 throughout).
    h = jnp.dot(x_ref[...], w1_ref[...], preferred_element_type=jnp.float32)
    h = h + b1_ref[...]                      # (TM, H) + (1, H) broadcast
    h = jnp.maximum(h, 0.0)
    # Second linear + sigmoid.
    y = jnp.dot(h, w2_ref[...], preferred_element_type=jnp.float32)
    y = y + b2_ref[...]                      # (TM, O) + (1, O) broadcast
    o_ref[...] = jax.nn.sigmoid(y).astype(o_ref.dtype)


def _round_up(n, m):
    return ((n + m - 1) // m) * m


def decoder_forward(x, w1_t, b1, w2_t, b2, *, tm=512):
    """x: (B, latent_dim + n_classes); w1_t: (in, hidden); w2_t: (hidden, out).

    tm is the batch tile (rows per grid step). It is clamped for small batches
    and the batch is zero-padded to a multiple of the tile.
    """
    B, D_in = x.shape
    H = w1_t.shape[1]
    O = w2_t.shape[1]

    # Effective tile: multiple of 8 (sublane), no larger than the padded batch.
    tm_eff = min(tm, _round_up(B, 8))
    B_pad = _round_up(B, tm_eff)
    if B_pad != B:
        x = jnp.pad(x, ((0, B_pad - B), (0, 0)))

    b1_2d = b1.reshape(1, H)
    b2_2d = b2.reshape(1, O)

    grid = (B_pad // tm_eff,)

    out = pl.pallas_call(
        decoder_kernel,
        out_shape=jax.ShapeDtypeStruct((B_pad, O), x.dtype),
        grid_spec=pl.GridSpec(
            grid=grid,
            in_specs=[
                # Batch-tiled activation: one (TM, D_in) block per grid step.
                pl.BlockSpec((tm_eff, D_in), lambda i: (i, 0)),
                # Weights / biases: constant block index -> VMEM-resident.
                pl.BlockSpec((D_in, H), lambda i: (0, 0)),
                pl.BlockSpec((1, H), lambda i: (0, 0)),
                pl.BlockSpec((H, O), lambda i: (0, 0)),
                pl.BlockSpec((1, O), lambda i: (0, 0)),
            ],
            out_specs=pl.BlockSpec((tm_eff, O), lambda i: (i, 0)),
        ),
        compiler_params=pltpu.CompilerParams(
            dimension_semantics=("parallel",),
        ),
    )(x, w1_t, b1_2d, w2_t, b2_2d)

    return out[:B] if B_pad != B else out


def init_linear_params(key, in_dim, out_dim, dtype=jnp.float32):
    """Deterministic init mimicking torch.nn.Linear default (uniform +/- 1/sqrt(in))."""
    kw, kb = jax.random.split(key)
    bound = 1.0 / jnp.sqrt(jnp.array(in_dim, dtype=jnp.float32))
    # PyTorch stores weight as (out, in); we keep transposed (in, out) for the kernel.
    w_t = jax.random.uniform(kw, (in_dim, out_dim), dtype, -bound, bound)
    b = jax.random.uniform(kb, (out_dim,), dtype, -bound, bound)
    return w_t, b


def reference_forward(x, w1_t, b1, w2_t, b2):
    h = jax.nn.relu(x @ w1_t + b1)
    return jax.nn.sigmoid(h @ w2_t + b2)


if __name__ == "__main__":
    # Module hyperparameters (small, consistent with the forward pass).
    latent_dim = 8
    n_classes = 4
    hidden_dim = 32
    output_dim = 64

    key = jax.random.PRNGKey(0)
    kx, k1, k2 = jax.random.split(key, 3)

    w1_t, b1 = init_linear_params(k1, latent_dim + n_classes, hidden_dim)
    w2_t, b2 = init_linear_params(k2, hidden_dim, output_dim)

    # Case 1: multi-tile batch -> exercises the pipelined / parallel grid.
    batch = 1024
    x = jax.random.normal(kx, (batch, latent_dim + n_classes), jnp.float32)
    out = jax.block_until_ready(decoder_forward(x, w1_t, b1, w2_t, b2, tm=256))
    ref = reference_forward(x, w1_t, b1, w2_t, b2)
    assert out.shape == (batch, output_dim)
    assert jnp.allclose(out, ref, atol=1e-5, rtol=1e-5)

    # Case 2: small, non-multiple-of-tile batch -> exercises the padding path.
    batch_small = 100
    x_small = jax.random.normal(kx, (batch_small, latent_dim + n_classes), jnp.float32)
    out_small = jax.block_until_ready(decoder_forward(x_small, w1_t, b1, w2_t, b2))
    ref_small = reference_forward(x_small, w1_t, b1, w2_t, b2)
    assert out_small.shape == (batch_small, output_dim)
    assert jnp.allclose(out_small, ref_small, atol=1e-5, rtol=1e-5)

    print("KERNEL_OK")
</pallas_src>

<mosaic_0001>
module attributes {stable_mosaic.version = 11 : i64} {
  func.func @decoder_kernel(%arg0: i32, %arg1: memref<256x12xf32, #tpu.memory_space<vmem>>, %arg2: memref<12x32xf32, #tpu.memory_space<vmem>>, %arg3: memref<1x32xf32, #tpu.memory_space<vmem>>, %arg4: memref<32x64xf32, #tpu.memory_space<vmem>>, %arg5: memref<1x64xf32, #tpu.memory_space<vmem>>, %arg6: memref<256x64xf32, #tpu.memory_space<vmem>>) attributes {dimension_semantics = [#tpu.dimension_semantics<parallel>], iteration_bounds = array<i64: 4>, scalar_prefetch = 0 : i64, scratch_operands = 0 : i64, tpu.core_type = #tpu.core_type<tc>, window_params = [{transform_indices = @transform_0, window_bounds = array<i64: 256, 12>}, {pipeline_mode = #tpu.pipeline_mode<synchronous>, transform_indices = @transform_1, window_bounds = array<i64: 12, 32>}, {pipeline_mode = #tpu.pipeline_mode<synchronous>, transform_indices = @transform_2, window_bounds = array<i64: 1, 32>}, {pipeline_mode = #tpu.pipeline_mode<synchronous>, transform_indices = @transform_3, window_bounds = array<i64: 32, 64>}, {pipeline_mode = #tpu.pipeline_mode<synchronous>, transform_indices = @transform_4, window_bounds = array<i64: 1, 64>}, {transform_indices = @transform_5, window_bounds = array<i64: 256, 64>}]} {
    %c0 = arith.constant 0 : index
    %c0_0 = arith.constant 0 : index
    %0 = vector.load %arg1[%c0, %c0_0] : memref<256x12xf32, #tpu.memory_space<vmem>>, vector<256x12xf32>
    %c0_1 = arith.constant 0 : index
    %c0_2 = arith.constant 0 : index
    %1 = vector.load %arg2[%c0_1, %c0_2] : memref<12x32xf32, #tpu.memory_space<vmem>>, vector<12x32xf32>
    %cst = arith.constant dense<0.000000e+00> : vector<256x32xf32>
    %2 = tpu.matmul %0, %1, %cst {dimension_numbers = #tpu.dot_dimension_numbers<[1], [0], [0], [1], [0, 0, 1, 1], [], []>} : vector<256x12xf32>, vector<12x32xf32>, vector<256x32xf32> -> vector<256x32xf32>
    %c0_3 = arith.constant 0 : index
    %c0_4 = arith.constant 0 : index
    %3 = vector.load %arg3[%c0_3, %c0_4] : memref<1x32xf32, #tpu.memory_space<vmem>>, vector<1x32xf32>
    %4 = vector.broadcast %3 : vector<1x32xf32> to vector<256x32xf32>
    %5 = arith.addf %2, %4 : vector<256x32xf32>
    %cst_5 = arith.constant 0.000000e+00 : f32
    %6 = vector.broadcast %cst_5 : f32 to vector<256x32xf32>
    %7 = arith.maximumf %5, %6 : vector<256x32xf32>
    %c0_6 = arith.constant 0 : index
    %c0_7 = arith.constant 0 : index
    %8 = vector.load %arg4[%c0_6, %c0_7] : memref<32x64xf32, #tpu.memory_space<vmem>>, vector<32x64xf32>
    %cst_8 = arith.constant dense<0.000000e+00> : vector<256x64xf32>
    %9 = tpu.matmul %7, %8, %cst_8 {dimension_numbers = #tpu.dot_dimension_numbers<[1], [0], [0], [1], [0, 0, 1, 1], [], []>} : vector<256x32xf32>, vector<32x64xf32>, vector<256x64xf32> -> vector<256x64xf32>
    %c0_9 = arith.constant 0 : index
    %c0_10 = arith.constant 0 : index
    %10 = vector.load %arg5[%c0_9, %c0_10] : memref<1x64xf32, #tpu.memory_space<vmem>>, vector<1x64xf32>
    %11 = vector.broadcast %10 : vector<1x64xf32> to vector<256x64xf32>
    %12 = arith.addf %9, %11 : vector<256x64xf32>
    %13 = arith.negf %12 : vector<256x64xf32>
    %14 = math.exp %13 : vector<256x64xf32>
    %cst_11 = arith.constant 1.000000e+00 : f32
    %15 = vector.broadcast %cst_11 : f32 to vector<256x64xf32>
    %16 = arith.addf %15, %14 : vector<256x64xf32>
    %17 = arith.divf %15, %16 : vector<256x64xf32>
    %c0_12 = arith.constant 0 : index
    %c0_13 = arith.constant 0 : index
    %18 = vector.load %arg6[%c0_12, %c0_13] : memref<256x64xf32, #tpu.memory_space<vmem>>, vector<256x64xf32>
    tpu.vector_store %arg6[%c0_12, %c0_13], %17 {strides = array<i32>} : memref<256x64xf32, #tpu.memory_space<vmem>>, vector<256x64xf32>,
    return
  }
  func.func @transform_0(%arg0: i32) -> (i32, i32) {
    %c0_i32 = arith.constant 0 : i32
    %c0_i32_0 = arith.constant 0 : i32
    return %arg0, %c0_i32 : i32, i32
  }
  func.func @transform_1(%arg0: i32) -> (i32, i32) {
    %c0_i32 = arith.constant 0 : i32
    %c0_i32_0 = arith.constant 0 : i32
    %c0_i32_1 = arith.constant 0 : i32
    return %c0_i32, %c0_i32_0 : i32, i32
  }
  func.func @transform_2(%arg0: i32) -> (i32, i32) {
    %c0_i32 = arith.constant 0 : i32
    %c0_i32_0 = arith.constant 0 : i32
    %c0_i32_1 = arith.constant 0 : i32
    return %c0_i32, %c0_i32_0 : i32, i32
  }
  func.func @transform_3(%arg0: i32) -> (i32, i32) {
    %c0_i32 = arith.constant 0 : i32
    %c0_i32_0 = arith.constant 0 : i32
    %c0_i32_1 = arith.constant 0 : i32
    return %c0_i32, %c0_i32_0 : i32, i32
  }
  func.func @transform_4(%arg0: i32) -> (i32, i32) {
    %c0_i32 = arith.constant 0 : i32
    %c0_i32_0 = arith.constant 0 : i32
    %c0_i32_1 = arith.constant 0 : i32
    return %c0_i32, %c0_i32_0 : i32, i32
  }
  func.func @transform_5(%arg0: i32) -> (i32, i32) {
    %c0_i32 = arith.constant 0 : i32
    %c0_i32_0 = arith.constant 0 : i32
    return %arg0, %c0_i32 : i32, i32
  }
}

</mosaic_0001>

<bundles_post_ra>
// kernel: tpu_custom_call.1
= control target key start
LH: loop header
LB: loop body
LE: loop exit
PB: predicated region body
PF: predicated region fallthrough
CT: control target
= control target key end

     0   :  { %s1719_s18 = smov 0   ;;  %s1999_s0 = inlined_call_operand.vmem [shape: f32[1024,12], index: 0, kind: input, shape index: {}]   ;;  %s2000_s1 = inlined_call_operand.vmem [shape: f32[12,32], index: 1, kind: input, shape index: {}]   ;;  %s2001_s2 = inlined_call_operand.vmem [shape: f32[1,32], index: 2, kind: input, shape index: {}]   ;;  %s2002_s3 = inlined_call_operand.vmem [shape: f32[32,64], index: 3, kind: input, shape index: {}]   ;;  %s2003_s4 = inlined_call_operand.vmem [shape: f32[1,64], index: 4, kind: input, shape index: {}]   ;;  %s2004_s5 = inlined_call_operand.vmem [shape: f32[1024,64], index: 5, kind: output, shape index: {}]  }
   0x1 LB: > { %s1241_s19 = sadd.s32 4294967295, %s1686_s18   ;;  %p1245_p0 = scmp.ge.s32.totalorder %s1686_s18, 1  ;;  %s1686_s18 = sphi %s1719_s18, %s15_s18  }
   0x2   : > { %p188_p1 = scmp.lt.s32.totalorder %s1686_s18, 5 }
   0x4   : > { %p189_p2 = pnand %p1245_p0, %p188_p1 }
   0x5   : > { %v260_v0 = vld [vmem:[%s2000_s1] sm:$0xff] (!%p189_p2)  ;;  %v261_v1 = vld [vmem:[%s2000_s1 + $0x8] sm:$0xf] (!%p189_p2)  ;;  %vm366_vm0 = vcmask (!%p189_p2), 1043456   ;;  %s1246_s24 = sshll.u32 (!%p189_p2), %s1241_s19, 5  ;;  %vm1688_vm1 = vmmov (!%p189_p2), 1  }
   0x6   : > { %192 = sbr.rel (%p189_p2) target bundleno = 541 (0x21d), region = 40  ;;  %v1529_v2 = vpack.c.bf16 (!%p189_p2), %v261_v1, %v260_v0  ;;  %vm1530_vm2 = vmpackc.low (!%p189_p2), %vm366_vm0, %vm1688_vm1  ;;  %p217_p3 = scmp.lt.s32.totalorder (!%p189_p2), %s1246_s24, 127  ;;  %v627_v3 = vld [vmem:[%s2002_s3] sm:$0xff] (!%p189_p2)  ;;  %v628_v4 = vld [vmem:[%s2002_s3 + $0x8] sm:$0xff] (!%p189_p2)  ;;  %vm269_vm3 = vcmask (!%p189_p2), 97280   ;;  %vm638_vm4 = vcmask (!%p189_p2), 261120  }
   0x7   : > { %v1535_v5 = vpack.c.bf16 (!%p189_p2), %v628_v4, %v627_v3  ;;  %v629_v38 = vld [vmem:[%s2002_s3 + $0x10] sm:$0xff] (!%p189_p2)  ;;  %v630_v39 = vld [vmem:[%s2002_s3 + $0x18] sm:$0xff] (!%p189_p2)  ;;  %v1822_v41 = vld [vmem:[%s2001_s2] ss:$0 sm:$0xff] (!%p189_p2)  ;;  %vm1152_vm5 = vcmask (!%p189_p2), 523264  }
   0x8   : > { %1531 = vmatprep.subr.msk.bf16.mxu0 (!%p189_p2), %vm1530_vm2, %v1529_v2  ;;  %v1539_v40 = vpack.c.bf16 (!%p189_p2), %v630_v39, %v629_v38 }
   0x9   : > { %1534 = vmatpush3.bf16.msk.msra.mxu0 (!%p189_p2), %vm1530_vm2, %v1529_v2  ;;  %1536 = vmatprep.subr.bf16.mxu1 (!%p189_p2), %v1535_v5 }
   0xa   : > { %1538 = vmatpush3.bf16.msra.mxu1 (!%p189_p2), %v1535_v5 }
   0xb   : > { %1540 = vmatprep.subr.bf16.mxu1 (!%p189_p2), %v1539_v40 }
   0xd   : > { %s2006_s24 = smov (!%p217_p3, %s1246_s24), 127 }
   0xe   : > { %s1247_s29 = sshll.u32 %s2006_s24, 3  ;;  %1542 = vmatpush3.bf16.msra.mxu1 %v1539_v40 }
   0xf   : > { %s1747_s7 = scalar_lea.vmem %s1999_s0, %s1247_s29  ;;  %s1911_s19 = scalar_lea.vmem %s2004_s5, %s1247_s29 }
  0x10   : > { %v228_v6 = vld [vmem:[%s1747_s7] sm:$0xff]  ;;  %v229_v7 = vld [vmem:[%s1747_s7 + $0x8] sm:$0xff]  ;;  %v230_v8 = vld [vmem:[%s1747_s7 + $0x10] sm:$0xff] }
  0x11   : > { %1425 = vmatprep.mubr.msk.f32.mxu0 %vm269_vm3, %v228_v6  ;;  %v231_v9 = vld [vmem:[%s1747_s7 + $0x18] sm:$0xff]  ;;  %v232_v10 = vld [vmem:[%s1747_s7 + $0x20] sm:$0xff]  ;;  %v233_v11 = vld [vmem:[%s1747_s7 + $0x28] sm:$0xff] }
  0x12   : > { %1426 = vmatmul.mubr.msk.f32.vlgmr.msra.gmra.mrb[0].mxu0 %vm269_vm3, %v229_v7  ;;  %v234_v12 = vld [vmem:[%s1747_s7 + $0x30] sm:$0xff]  ;;  %v235_v13 = vld [vmem:[%s1747_s7 + $0x38] sm:$0xff]  ;;  %v236_v14 = vld [vmem:[%s1747_s7 + $0x40] sm:$0xff] }
  0x13   : > { %1428 = vmatprep.mubr.msk.f32.mxu0 %vm269_vm3, %v230_v8  ;;  %v237_v15 = vld [vmem:[%s1747_s7 + $0x48] sm:$0xff]  ;;  %v238_v16 = vld [vmem:[%s1747_s7 + $0x50] sm:$0xff]  ;;  %v239_v17 = vld [vmem:[%s1747_s7 + $0x58] sm:$0xff] }
  0x14   : > { %v240_v18 = vld [vmem:[%s1747_s7 + $0x60] sm:$0xff]  ;;  %v241_v19 = vld [vmem:[%s1747_s7 + $0x68] sm:$0xff]  ;;  %v242_v20 = vld [vmem:[%s1747_s7 + $0x70] sm:$0xff] }
  0x15   : > { %v243_v21 = vld [vmem:[%s1747_s7 + $0x78] sm:$0xff]  ;;  %v244_v22 = vld [vmem:[%s1747_s7 + $0x80] sm:$0xff]  ;;  %v245_v23 = vld [vmem:[%s1747_s7 + $0x88] sm:$0xff] }
  0x16   : > { %1429 = vmatmul.mubr.msk.f32.gmra.mrb[2].mxu0 %vm269_vm3, %v231_v9  ;;  %v246_v24 = vld [vmem:[%s1747_s7 + $0x90] sm:$0xff]  ;;  %v247_v25 = vld [vmem:[%s1747_s7 + $0x98] sm:$0xff]  ;;  %v248_v26 = vld [vmem:[%s1747_s7 + $0xa0] sm:$0xff] }
  0x17   : > { %1431 = vmatprep.mubr.msk.f32.mxu0 %vm269_vm3, %v232_v10  ;;  %v249_v27 = vld [vmem:[%s1747_s7 + $0xa8] sm:$0xff]  ;;  %v250_v28 = vld [vmem:[%s1747_s7 + $0xb0] sm:$0xff]  ;;  %v251_v29 = vld [vmem:[%s1747_s7 + $0xb8] sm:$0xff] }
  0x18   : > { %v252_v30 = vld [vmem:[%s1747_s7 + $0xc0] sm:$0xff]  ;;  %v253_v31 = vld [vmem:[%s1747_s7 + $0xc8] sm:$0xff]  ;;  %v254_v32 = vld [vmem:[%s1747_s7 + $0xd0] sm:$0xff] }
  0x19   : > { %v255_v33 = vld [vmem:[%s1747_s7 + $0xd8] sm:$0xff]  ;;  %v256_v34 = vld [vmem:[%s1747_s7 + $0xe0] sm:$0xff]  ;;  %v257_v35 = vld [vmem:[%s1747_s7 + $0xe8] sm:$0xff] }
  0x1a   : > { %1432 = vmatmul.mubr.msk.f32.gmra.mrb[4].mxu0 %vm269_vm3, %v233_v11  ;;  %v258_v36 = vld [vmem:[%s1747_s7 + $0xf0] sm:$0xff]  ;;  %v259_v37 = vld [vmem:[%s1747_s7 + $0xf8] sm:$0xff] }
  0x1b   : > { %1434 = vmatprep.mubr.msk.f32.mxu0 %vm269_vm3, %v234_v12 }
  0x1e   : > { %1435 = vmatmul.mubr.msk.f32.gmra.mrb[6].mxu0 %vm269_vm3, %v235_v13 }
  0x1f   : > { %1437 = vmatprep.mubr.msk.f32.mxu0 %vm269_vm3, %v236_v14 }
  0x22   : > { %1438 = vmatmul.mubr.msk.f32.gmra.mrb[8].mxu0 %vm269_vm3, %v237_v15 }
  0x23   : > { %1440 = vmatprep.mubr.msk.f32.mxu0 %vm269_vm3, %v238_v16 }
  0x26   : > { %1441 = vmatmul.mubr.msk.f32.gmra.mrb[10].mxu0 %vm269_vm3, %v239_v17 }
  0x27   : > { %1443 = vmatprep.mubr.msk.f32.mxu0 %vm269_vm3, %v240_v18 }
  0x2a   : > { %1444 = vmatmul.mubr.msk.f32.gmra.mrb[12].mxu0 %vm269_vm3, %v241_v19 }
  0x2b   : > { %1446 = vmatprep.mubr.msk.f32.mxu0 %vm269_vm3, %v242_v20 }
  0x2e   : > { %1447 = vmatmul.mubr.msk.f32.gmra.mrb[14].mxu0 %vm269_vm3, %v243_v21 }
  0x2f   : > { %1449 = vmatprep.mubr.msk.f32.mxu0 %vm269_vm3, %v244_v22 }
  0x32   : > { %1450 = vmatmul.mubr.msk.f32.gmra.mrb[16].mxu0 %vm269_vm3, %v245_v23 }
  0x33   : > { %1452 = vmatprep.mubr.msk.f32.mxu0 %vm269_vm3, %v246_v24 }
  0x36   : > { %1453 = vmatmul.mubr.msk.f32.gmra.mrb[18].mxu0 %vm269_vm3, %v247_v25 }
  0x37   : > { %1455 = vmatprep.mubr.msk.f32.mxu0 %vm269_vm3, %v248_v26 }
  0x3a   : > { %1456 = vmatmul.mubr.msk.f32.gmra.mrb[20].mxu0 %vm269_vm3, %v249_v27 }
  0x3b   : > { %1458 = vmatprep.mubr.msk.f32.mxu0 %vm269_vm3, %v250_v28 }
  0x3e   : > { %1459 = vmatmul.mubr.msk.f32.gmra.mrb[22].mxu0 %vm269_vm3, %v251_v29 }
  0x3f   : > { %1461 = vmatprep.mubr.msk.f32.mxu0 %vm269_vm3, %v252_v30 }
  0x42   : > { %1462 = vmatmul.mubr.msk.f32.gmra.mrb[24].mxu0 %vm269_vm3, %v253_v31 }
  0x43   : > { %1464 = vmatprep.mubr.msk.f32.mxu0 %vm269_vm3, %v254_v32 }
  0x46   : > { %1465 = vmatmul.mubr.msk.f32.gmra.mrb[26].mxu0 %vm269_vm3, %v255_v33 }
  0x47   : > { %1467 = vmatprep.mubr.msk.f32.mxu0 %vm269_vm3, %v256_v34 }
  0x4a   : > { %1468 = vmatmul.mubr.msk.f32.gmra.mrb[28].mxu0 %vm269_vm3, %v257_v35 }
  0x4b   : > { %1470 = vmatprep.mubr.msk.f32.mxu0 %vm269_vm3, %v258_v36 }
  0x4e   : > { %1471 = vmatmul.mubr.msk.f32.gmra.mrb[30].mxu0 %vm269_vm3, %v259_v37 }
  0xe5   : > { %v1427_v42 = vpop.f32.mrb[0].mxu0 }
  0xe6   : > { %v442_v43 = vadd.f32 %v1427_v42, %v1822_v41  ;;  %v436_v44 = vpop.f32.mrb[1].mxu0 }
  0xe7   : > { %v437_v45 = vadd.f32 %v1822_v41, %v436_v44 }
  0xe8   : > { %v596_v48 = vmax.f32 %v442_v43, 0.0 }
  0xe9   : > { %v595_v46 = vmax.f32 %v437_v45, 0.0  ;;  %v1430_v47 = vpop.f32.mrb[2].mxu0 }
  0xea   : > { %v452_v49 = vadd.f32 %v1430_v47, %v1822_v41  ;;  %v446_v50 = vpop.f32.mrb[3].mxu0 }
  0xeb   : > { %v447_v51 = vadd.f32 %v1822_v41, %v446_v50  ;;  %1481 = vmatprep.mubr.msk.f32.mxu1 %vm638_vm4, %v595_v46 }
  0xec   : > { %1482 = vmatmul.mubr.msk.f32.vlgmr.msra.gmra.mrb[0].mxu1 %vm638_vm4, %v596_v48  ;;  %v598_v54 = vmax.f32 %v452_v49, 0.0 }
  0xed   : > { %v597_v52 = vmax.f32 %v447_v51, 0.0  ;;  %v1433_v53 = vpop.f32.mrb[4].mxu0 }
  0xee   : > { %v462_v55 = vadd.f32 %v1433_v53, %v1822_v41  ;;  %v456_v56 = vpop.f32.mrb[5].mxu0 }
  0xef   : > { %v457_v57 = vadd.f32 %v1822_v41, %v456_v56  ;;  %1484 = vmatprep.mubr.msk.f32.mxu1 %vm638_vm4, %v597_v52 }
  0xf0   : > { %1485 = vmatmul.mubr.msk.f32.gmra.mrb[2].mxu1 %vm638_vm4, %v598_v54  ;;  %v600_v60 = vmax.f32 %v462_v55, 0.0 }
  0xf1   : > { %v599_v58 = vmax.f32 %v457_v57, 0.0  ;;  %v1436_v59 = vpop.f32.mrb[6].mxu0 }
  0xf2   : > { %v472_v61 = vadd.f32 %v1436_v59, %v1822_v41  ;;  %v466_v62 = vpop.f32.mrb[7].mxu0 }
  0xf3   : > { %v467_v63 = vadd.f32 %v1822_v41, %v466_v62  ;;  %1487 = vmatprep.mubr.msk.f32.mxu1 %vm638_vm4, %v599_v58 }
  0xf4   : > { %1488 = vmatmul.mubr.msk.f32.gmra.mrb[4].mxu1 %vm638_vm4, %v600_v60  ;;  %v602_v2 = vmax.f32 %v472_v61, 0.0 }
  0xf5   : > { %v601_v0 = vmax.f32 %v467_v63, 0.0  ;;  %v1439_v1 = vpop.f32.mrb[8].mxu0 }
  0xf6   : > { %v482_v3 = vadd.f32 %v1439_v1, %v1822_v41  ;;  %v476_v4 = vpop.f32.mrb[9].mxu0 }
  0xf7   : > { %v477_v5 = vadd.f32 %v1822_v41, %v476_v4  ;;  %1490 = vmatprep.mubr.msk.f32.mxu1 %vm638_vm4, %v601_v0 }
  0xf8   : > { %1491 = vmatmul.mubr.msk.f32.gmra.mrb[6].mxu1 %vm638_vm4, %v602_v2  ;;  %v604_v8 = vmax.f32 %v482_v3, 0.0 }
  0xf9   : > { %v603_v6 = vmax.f32 %v477_v5, 0.0  ;;  %v1442_v7 = vpop.f32.mrb[10].mxu0 }
  0xfa   : > { %v492_v9 = vadd.f32 %v1442_v7, %v1822_v41  ;;  %v486_v10 = vpop.f32.mrb[11].mxu0 }
  0xfb   : > { %v487_v11 = vadd.f32 %v1822_v41, %v486_v10  ;;  %1493 = vmatprep.mubr.msk.f32.mxu1 %vm638_vm4, %v603_v6 }
  0xfc   : > { %1494 = vmatmul.mubr.msk.f32.gmra.mrb[8].mxu1 %vm638_vm4, %v604_v8  ;;  %v606_v14 = vmax.f32 %v492_v9, 0.0 }
  0xfd   : > { %v605_v12 = vmax.f32 %v487_v11, 0.0  ;;  %v1445_v13 = vpop.f32.mrb[12].mxu0  ;;  %v1891_v11 = vld [vmem:[%s2003_s4] ss:$0 sm:$0xff] }
  0xfe   : > { %v502_v15 = vadd.f32 %v1445_v13, %v1822_v41  ;;  %v496_v16 = vpop.f32.mrb[13].mxu0 }
  0xff   : > { %v497_v17 = vadd.f32 %v1822_v41, %v496_v16  ;;  %1496 = vmatprep.mubr.msk.f32.mxu1 %vm638_vm4, %v605_v12 }
 0x100   : > { %1497 = vmatmul.mubr.msk.f32.gmra.mrb[10].mxu1 %vm638_vm4, %v606_v14  ;;  %v608_v20 = vmax.f32 %v502_v15, 0.0 }
 0x101   : > { %v607_v18 = vmax.f32 %v497_v17, 0.0  ;;  %v1448_v19 = vpop.f32.mrb[14].mxu0 }
 0x102   : > { %v512_v21 = vadd.f32 %v1448_v19, %v1822_v41  ;;  %v506_v22 = vpop.f32.mrb[15].mxu0 }
 0x103   : > { %v507_v23 = vadd.f32 %v1822_v41, %v506_v22  ;;  %1499 = vmatprep.mubr.msk.f32.mxu1 %vm638_vm4, %v607_v18 }
 0x104   : > { %1500 = vmatmul.mubr.msk.f32.gmra.mrb[12].mxu1 %vm638_vm4, %v608_v20  ;;  %v610_v26 = vmax.f32 %v512_v21, 0.0 }
 0x105   : > { %v609_v24 = vmax.f32 %v507_v23, 0.0  ;;  %v1451_v25 = vpop.f32.mrb[16].mxu0 }
 0x106   : > { %v522_v27 = vadd.f32 %v1451_v25, %v1822_v41  ;;  %v516_v28 = vpop.f32.mrb[17].mxu0 }
 0x107   : > { %v517_v29 = vadd.f32 %v1822_v41, %v516_v28  ;;  %1502 = vmatprep.mubr.msk.f32.mxu1 %vm638_vm4, %v609_v24 }
 0x108   : > { %1503 = vmatmul.mubr.msk.f32.gmra.mrb[14].mxu1 %vm638_vm4, %v610_v26  ;;  %v612_v32 = vmax.f32 %v522_v27, 0.0 }
 0x109   : > { %v611_v30 = vmax.f32 %v517_v29, 0.0  ;;  %v1454_v31 = vpop.f32.mrb[18].mxu0 }
 0x10a   : > { %v532_v33 = vadd.f32 %v1454_v31, %v1822_v41  ;;  %v526_v34 = vpop.f32.mrb[19].mxu0 }
 0x10b   : > { %v527_v35 = vadd.f32 %v1822_v41, %v526_v34  ;;  %1505 = vmatprep.mubr.msk.f32.mxu1 %vm638_vm4, %v611_v30 }
 0x10c   : > { %1506 = vmatmul.mubr.msk.f32.gmra.mrb[16].mxu1 %vm638_vm4, %v612_v32  ;;  %v614_v38 = vmax.f32 %v532_v33, 0.0 }
 0x10d   : > { %v613_v36 = vmax.f32 %v527_v35, 0.0  ;;  %v1457_v37 = vpop.f32.mrb[20].mxu0 }
 0x10e   : > { %v542_v39 = vadd.f32 %v1457_v37, %v1822_v41  ;;  %v536_v40 = vpop.f32.mrb[21].mxu0 }
 0x10f   : > { %v537_v42 = vadd.f32 %v1822_v41, %v536_v40  ;;  %1508 = vmatprep.mubr.msk.f32.mxu1 %vm638_vm4, %v613_v36 }
 0x110   : > { %1509 = vmatmul.mubr.msk.f32.gmra.mrb[18].mxu1 %vm638_vm4, %v614_v38  ;;  %v616_v45 = vmax.f32 %v542_v39, 0.0 }
 0x111   : > { %v615_v43 = vmax.f32 %v537_v42, 0.0  ;;  %v1460_v44 = vpop.f32.mrb[22].mxu0 }
 0x112   : > { %v552_v46 = vadd.f32 %v1460_v44, %v1822_v41  ;;  %v546_v47 = vpop.f32.mrb[23].mxu0 }
 0x113   : > { %v547_v48 = vadd.f32 %v1822_v41, %v546_v47  ;;  %1511 = vmatprep.mubr.msk.f32.mxu1 %vm638_vm4, %v615_v43 }
 0x114   : > { %1512 = vmatmul.mubr.msk.f32.gmra.mrb[20].mxu1 %vm638_vm4, %v616_v45  ;;  %v618_v51 = vmax.f32 %v552_v46, 0.0 }
 0x115   : > { %v617_v49 = vmax.f32 %v547_v48, 0.0  ;;  %v1463_v50 = vpop.f32.mrb[24].mxu0 }
 0x116   : > { %v562_v52 = vadd.f32 %v1463_v50, %v1822_v41  ;;  %v556_v53 = vpop.f32.mrb[25].mxu0 }
 0x117   : > { %v557_v54 = vadd.f32 %v1822_v41, %v556_v53  ;;  %1514 = vmatprep.mubr.msk.f32.mxu1 %vm638_vm4, %v617_v49 }
 0x118   : > { %1515 = vmatmul.mubr.msk.f32.gmra.mrb[22].mxu1 %vm638_vm4, %v618_v51  ;;  %v620_v57 = vmax.f32 %v562_v52, 0.0 }
 0x119   : > { %v619_v55 = vmax.f32 %v557_v54, 0.0  ;;  %v1466_v56 = vpop.f32.mrb[26].mxu0 }
 0x11a   : > { %v572_v58 = vadd.f32 %v1466_v56, %v1822_v41  ;;  %v566_v59 = vpop.f32.mrb[27].mxu0 }
 0x11b   : > { %v567_v60 = vadd.f32 %v1822_v41, %v566_v59  ;;  %1517 = vmatprep.mubr.msk.f32.mxu1 %vm638_vm4, %v619_v55 }
 0x11c   : > { %1518 = vmatmul.mubr.msk.f32.gmra.mrb[24].mxu1 %vm638_vm4, %v620_v57  ;;  %v622_v63 = vmax.f32 %v572_v58, 0.0 }
 0x11d   : > { %v621_v61 = vmax.f32 %v567_v60, 0.0  ;;  %v1469_v62 = vpop.f32.mrb[28].mxu0 }
 0x11e   : > { %v582_v0 = vadd.f32 %v1469_v62, %v1822_v41  ;;  %v576_v1 = vpop.f32.mrb[29].mxu0 }
 0x11f   : > { %v577_v2 = vadd.f32 %v1822_v41, %v576_v1  ;;  %1520 = vmatprep.mubr.msk.f32.mxu1 %vm638_vm4, %v621_v61 }
 0x120   : > { %1521 = vmatmul.mubr.msk.f32.gmra.mrb[26].mxu1 %vm638_vm4, %v622_v63  ;;  %v624_v5 = vmax.f32 %v582_v0, 0.0 }
 0x121   : > { %v623_v3 = vmax.f32 %v577_v2, 0.0  ;;  %v1472_v4 = vpop.f32.mrb[30].mxu0 }
 0x122   : > { %v592_v6 = vadd.f32 %v1472_v4, %v1822_v41  ;;  %v586_v7 = vpop.f32.mrb[31].mxu0 }
 0x123   : > { %v587_v8 = vadd.f32 %v1822_v41, %v586_v7  ;;  %1523 = vmatprep.mubr.msk.f32.mxu1 %vm638_vm4, %v623_v3 }
 0x124   : > { %1524 = vmatmul.mubr.msk.f32.gmra.mrb[28].mxu1 %vm638_vm4, %v624_v5  ;;  %v626_v10 = vmax.f32 %v592_v6, 0.0 }
 0x125   : > { %v625_v9 = vmax.f32 %v587_v8, 0.0 }
 0x127   : > { %1526 = vmatprep.mubr.msk.f32.mxu1 %vm638_vm4, %v625_v9 }
 0x128   : > { %1527 = vmatmul.mubr.msk.f32.gmra.mrb[30].mxu1 %vm638_vm4, %v626_v10 }
 0x1bf   : > { %v1483_v12 = vpop.f32.mrb[0].mxu1 }
 0x1c0   : > { %v807_v13 = vadd.f32 %v1483_v12, %v1891_v11  ;;  %v801_v14 = vpop.f32.mrb[1].mxu1 }
 0x1c1   : > { %v802_v41 = vadd.f32 %v1891_v11, %v801_v14 }
 0x1c2   : > { %v1318_v15 = vmul.f32 -1.442695, %v807_v13 }
 0x1c3   : > { %v1317_v16 = vmul.f32 -1.442695, %v802_v41  ;;  %v1486_v17 = vpop.f32.mrb[2].mxu1 }
 0x1c4   : > { %1552 = vpow2.f32 %v1318_v15  ;;  %v817_v18 = vadd.f32 %v1486_v17, %v1891_v11  ;;  %v811_v19 = vpop.f32.mrb[3].mxu1 }
 0x1c5   : > { %1554 = vpow2.f32 %v1317_v16  ;;  %v812_v20 = vadd.f32 %v1891_v11, %v811_v19 }
 0x1c6   : > { %v1320_v21 = vmul.f32 -1.442695, %v817_v18 }
 0x1c7   : > { %v1319_v22 = vmul.f32 -1.442695, %v812_v20  ;;  %v1489_v23 = vpop.f32.mrb[4].mxu1 }
 0x1c8   : > { %1556 = vpow2.f32 %v1320_v21  ;;  %v827_v24 = vadd.f32 %v1489_v23, %v1891_v11  ;;  %v821_v25 = vpop.f32.mrb[5].mxu1 }
 0x1c9   : > { %1558 = vpow2.f32 %v1319_v22  ;;  %v822_v26 = vadd.f32 %v1891_v11, %v821_v25 }
 0x1ca   : > { %v1322_v27 = vmul.f32 -1.442695, %v827_v24 }
 0x1cb   : > { %v1321_v28 = vmul.f32 -1.442695, %v822_v26  ;;  %v1492_v29 = vpop.f32.mrb[6].mxu1 }
 0x1cc   : > { %1560 = vpow2.f32 %v1322_v27  ;;  %v837_v30 = vadd.f32 %v1492_v29, %v1891_v11  ;;  %v831_v31 = vpop.f32.mrb[7].mxu1 }
 0x1cd   : > { %1562 = vpow2.f32 %v1321_v28  ;;  %v832_v32 = vadd.f32 %v1891_v11, %v831_v31 }
 0x1ce   : > { %v1553_v33 = vpop.eup %1552  ;;  %v1324_v34 = vmul.f32 -1.442695, %v837_v30 }
 0x1cf   : > { %v1555_v35 = vpop.eup %1554  ;;  %v1057_v36 = vadd.f32 1.0, %v1553_v33  ;;  %v1323_v37 = vmul.f32 -1.442695, %v832_v32  ;;  %v1495_v38 = vpop.f32.mrb[8].mxu1 }
 0x1d0   : > { %v1056_v39 = vadd.f32 1.0, %v1555_v35  ;;  %1564 = vpow2.f32 %v1324_v34  ;;  %v847_v40 = vadd.f32 %v1495_v38, %v1891_v11  ;;  %v841_v42 = vpop.f32.mrb[9].mxu1 }
 0x1d1   : > { %1566 = vrcp.f32 %v1057_v36  ;;  %v842_v43 = vadd.f32 %v1891_v11, %v841_v42 }
 0x1d2   : > { %v1557_v44 = vpop.eup %1556  ;;  %1568 = vrcp.f32 %v1056_v39  ;;  %v1326_v45 = vmul.f32 -1.442695, %v847_v40 }
 0x1d3   : > { %v1559_v46 = vpop.eup %1558  ;;  %v1059_v47 = vadd.f32 1.0, %v1557_v44  ;;  %1570 = vpow2.f32 %v1323_v37  ;;  %v1325_v48 = vmul.f32 -1.442695, %v842_v43  ;;  %v1498_v49 = vpop.f32.mrb[10].mxu1 }
 0x1d4   : > { %v1058_v50 = vadd.f32 1.0, %v1559_v46  ;;  %1572 = vpow2.f32 %v1326_v45  ;;  %v857_v51 = vadd.f32 %v1498_v49, %v1891_v11  ;;  %v851_v52 = vpop.f32.mrb[11].mxu1 }
 0x1d5   : > { %1574 = vrcp.f32 %v1059_v47  ;;  %v852_v53 = vadd.f32 %v1891_v11, %v851_v52 }
 0x1d6   : > { %v1561_v54 = vpop.eup %1560  ;;  %1576 = vrcp.f32 %v1058_v50  ;;  %v1328_v55 = vmul.f32 -1.442695, %v857_v51 }
 0x1d7   : > { %v1563_v56 = vpop.eup %1562  ;;  %v1061_v57 = vadd.f32 1.0, %v1561_v54  ;;  %1578 = vpow2.f32 %v1325_v48  ;;  %v1327_v58 = vmul.f32 -1.442695, %v852_v53  ;;  %v1501_v59 = vpop.f32.mrb[12].mxu1 }
 0x1d8   : > { %v1060_v60 = vadd.f32 1.0, %v1563_v56  ;;  %1580 = vpow2.f32 %v1328_v55  ;;  %v867_v61 = vadd.f32 %v1501_v59, %v1891_v11  ;;  %v861_v62 = vpop.f32.mrb[13].mxu1 }
 0x1d9   : > { %1582 = vrcp.f32 %v1061_v57  ;;  %v862_v63 = vadd.f32 %v1891_v11, %v861_v62 }
 0x1da   : > { %v1565_v0 = vpop.eup %1564  ;;  %1584 = vrcp.f32 %v1060_v60  ;;  %v1330_v1 = vmul.f32 -1.442695, %v867_v61 }
 0x1db   : > { %v1567_v2 = vpop.eup %1566  ;;  %v1063_v3 = vadd.f32 1.0, %v1565_v0  ;;  %1586 = vpow2.f32 %v1327_v58  ;;  %v1329_v4 = vmul.f32 -1.442695, %v862_v63  ;;  %v1504_v5 = vpop.f32.mrb[14].mxu1 }
 0x1dc   : > { %v1569_v6 = vpop.eup %1568  ;;  %1154 = vst.msk [vmem:[%s1911_s19 + $0x8] sm:$0xff] %vm1152_vm5, %v1567_v2  ;;  %1588 = vpow2.f32 %v1330_v1  ;;  %v877_v7 = vadd.f32 %v1504_v5, %v1891_v11  ;;  %v871_v8 = vpop.f32.mrb[15].mxu1 }
 0x1dd   : > { %v1571_v9 = vpop.eup %1570  ;;  %1153 = vst.msk [vmem:[%s1911_s19] sm:$0xff] %vm1152_vm5, %v1569_v6  ;;  %1590 = vrcp.f32 %v1063_v3  ;;  %v872_v10 = vadd.f32 %v1891_v11, %v871_v8 }
 0x1de   : > { %v1573_v12 = vpop.eup %1572  ;;  %v1062_v13 = vadd.f32 1.0, %v1571_v9  ;;  %1592 = vpow2.f32 %v1329_v4  ;;  %v1332_v14 = vmul.f32 -1.442695, %v877_v7 }
 0x1df   : > { %v1575_v41 = vpop.eup %1574  ;;  %v1065_v15 = vadd.f32 1.0, %v1573_v12  ;;  %v1331_v16 = vmul.f32 -1.442695, %v872_v10  ;;  %v1507_v17 = vpop.f32.mrb[16].mxu1 }
 0x1e0   : > { %v1577_v18 = vpop.eup %1576  ;;  %1156 = vst.msk [vmem:[%s1911_s19 + $0x18] sm:$0xff] %vm1152_vm5, %v1575_v41  ;;  %1594 = vrcp.f32 %v1062_v13  ;;  %v887_v19 = vadd.f32 %v1507_v17, %v1891_v11  ;;  %v881_v20 = vpop.f32.mrb[17].mxu1 }
 0x1e1   : > { %v1579_v21 = vpop.eup %1578  ;;  %1155 = vst.msk [vmem:[%s1911_s19 + $0x10] sm:$0xff] %vm1152_vm5, %v1577_v18  ;;  %1596 = vrcp.f32 %v1065_v15  ;;  %v882_v22 = vadd.f32 %v1891_v11, %v881_v20 }
 0x1e2   : > { %v1581_v23 = vpop.eup %1580  ;;  %v1064_v24 = vadd.f32 1.0, %v1579_v21  ;;  %1598 = vpow2.f32 %v1332_v14  ;;  %v1334_v25 = vmul.f32 -1.442695, %v887_v19 }
 0x1e3   : > { %v1583_v26 = vpop.eup %1582  ;;  %v1067_v27 = vadd.f32 1.0, %v1581_v23  ;;  %1600 = vpow2.f32 %v1331_v16  ;;  %v1333_v28 = vmul.f32 -1.442695, %v882_v22  ;;  %v1510_v29 = vpop.f32.mrb[18].mxu1 }
 0x1e4   : > { %v1585_v30 = vpop.eup %1584  ;;  %1158 = vst.msk [vmem:[%s1911_s19 + $0x28] sm:$0xff] %vm1152_vm5, %v1583_v26  ;;  %1602 = vrcp.f32 %v1064_v24  ;;  %v897_v31 = vadd.f32 %v1510_v29, %v1891_v11  ;;  %v891_v32 = vpop.f32.mrb[19].mxu1 }
 0x1e5   : > { %v1587_v33 = vpop.eup %1586  ;;  %1157 = vst.msk [vmem:[%s1911_s19 + $0x20] sm:$0xff] %vm1152_vm5, %v1585_v30  ;;  %1604 = vrcp.f32 %v1067_v27  ;;  %v892_v34 = vadd.f32 %v1891_v11, %v891_v32 }
 0x1e6   : > { %v1589_v35 = vpop.eup %1588  ;;  %v1066_v36 = vadd.f32 1.0, %v1587_v33  ;;  %1606 = vpow2.f32 %v1334_v25  ;;  %v1336_v37 = vmul.f32 -1.442695, %v897_v31 }
 0x1e7   : > { %v1591_v38 = vpop.eup %1590  ;;  %v1069_v39 = vadd.f32 1.0, %v1589_v35  ;;  %1608 = vpow2.f32 %v1333_v28  ;;  %v1513_v40 = vpop.f32.mrb[20].mxu1  ;;  %v1335_v43 = vmul.f32 -1.442695, %v892_v34 }
 0x1e8   : > { %v1593_v42 = vpop.eup %1592  ;;  %1160 = vst.msk [vmem:[%s1911_s19 + $0x38] sm:$0xff] %vm1152_vm5, %v1591_v38  ;;  %1610 = vrcp.f32 %v1066_v36  ;;  %v907_v44 = vadd.f32 %v1513_v40, %v1891_v11  ;;  %v901_v45 = vpop.f32.mrb[21].mxu1 }
 0x1e9   : > { %1612 = vrcp.f32 %v1069_v39  ;;  %v1068_v46 = vadd.f32 1.0, %v1593_v42  ;;  %v902_v47 = vadd.f32 %v1891_v11, %v901_v45 }
 0x1ea   : > { %v1595_v48 = vpop.eup %1594  ;;  %1614 = vpow2.f32 %v1336_v37  ;;  %v1338_v49 = vmul.f32 -1.442695, %v907_v44 }
 0x1eb   : > { %v1597_v50 = vpop.eup %1596  ;;  %1159 = vst.msk [vmem:[%s1911_s19 + $0x30] sm:$0xff] %vm1152_vm5, %v1595_v48  ;;  %1616 = vrcp.f32 %v1068_v46  ;;  %v1337_v51 = vmul.f32 -1.442695, %v902_v47  ;;  %v1516_v52 = vpop.f32.mrb[22].mxu1 }
 0x1ec   : > { %v1599_v53 = vpop.eup %1598  ;;  %1162 = vst.msk [vmem:[%s1911_s19 + $0x48] sm:$0xff] %vm1152_vm5, %v1597_v50  ;;  %1618 = vpow2.f32 %v1335_v43  ;;  %v917_v54 = vadd.f32 %v1516_v52, %v1891_v11  ;;  %v911_v55 = vpop.f32.mrb[23].mxu1 }
 0x1ed   : > { %v1601_v56 = vpop.eup %1600  ;;  %v1071_v57 = vadd.f32 1.0, %v1599_v53  ;;  %1620 = vpow2.f32 %v1338_v49  ;;  %v912_v58 = vadd.f32 %v1891_v11, %v911_v55 }
 0x1ee   : > { %v1603_v59 = vpop.eup %1602  ;;  %v1070_v60 = vadd.f32 1.0, %v1601_v56  ;;  %1622 = vpow2.f32 %v1337_v51  ;;  %v1340_v61 = vmul.f32 -1.442695, %v917_v54 }
 0x1ef   : > { %v1605_v62 = vpop.eup %1604  ;;  %1161 = vst.msk [vmem:[%s1911_s19 + $0x40] sm:$0xff] %vm1152_vm5, %v1603_v59  ;;  %1624 = vrcp.f32 %v1071_v57  ;;  %v1339_v63 = vmul.f32 -1.442695, %v912_v58  ;;  %v1519_v0 = vpop.f32.mrb[24].mxu1 }
 0x1f0   : > { %v1607_v1 = vpop.eup %1606  ;;  %1164 = vst.msk [vmem:[%s1911_s19 + $0x58] sm:$0xff] %vm1152_vm5, %v1605_v62  ;;  %1626 = vrcp.f32 %v1070_v60  ;;  %v927_v2 = vadd.f32 %v1519_v0, %v1891_v11  ;;  %v921_v3 = vpop.f32.mrb[25].mxu1 }
 0x1f1   : > { %v1609_v4 = vpop.eup %1608  ;;  %v1073_v5 = vadd.f32 1.0, %v1607_v1  ;;  %1628 = vpow2.f32 %v1340_v61  ;;  %v922_v6 = vadd.f32 %v1891_v11, %v921_v3 }
 0x1f2   : > { %v1611_v7 = vpop.eup %1610  ;;  %v1072_v8 = vadd.f32 1.0, %v1609_v4  ;;  %1630 = vpow2.f32 %v1339_v63  ;;  %v1342_v9 = vmul.f32 -1.442695, %v927_v2 }
 0x1f3   : > { %v1613_v10 = vpop.eup %1612  ;;  %1163 = vst.msk [vmem:[%s1911_s19 + $0x50] sm:$0xff] %vm1152_vm5, %v1611_v7  ;;  %1632 = vrcp.f32 %v1073_v5  ;;  %v1341_v12 = vmul.f32 -1.442695, %v922_v6  ;;  %v1522_v13 = vpop.f32.mrb[26].mxu1 }
 0x1f4   : > { %v1615_v14 = vpop.eup %1614  ;;  %1166 = vst.msk [vmem:[%s1911_s19 + $0x68] sm:$0xff] %vm1152_vm5, %v1613_v10  ;;  %1634 = vrcp.f32 %v1072_v8  ;;  %v937_v41 = vadd.f32 %v1522_v13, %v1891_v11  ;;  %v931_v15 = vpop.f32.mrb[27].mxu1 }
 0x1f5   : > { %v1617_v16 = vpop.eup %1616  ;;  %v1075_v17 = vadd.f32 1.0, %v1615_v14  ;;  %1636 = vpow2.f32 %v1342_v9  ;;  %v932_v18 = vadd.f32 %v1891_v11, %v931_v15 }
 0x1f6   : > { %v1619_v19 = vpop.eup %1618  ;;  %1165 = vst.msk [vmem:[%s1911_s19 + $0x60] sm:$0xff] %vm1152_vm5, %v1617_v16  ;;  %1638 = vpow2.f32 %v1341_v12  ;;  %v1344_v20 = vmul.f32 -1.442695, %v937_v41 }
 0x1f7   : > { %v1621_v21 = vpop.eup %1620  ;;  %1640 = vrcp.f32 %v1075_v17  ;;  %v1074_v22 = vadd.f32 1.0, %v1619_v19  ;;  %v1525_v23 = vpop.f32.mrb[28].mxu1  ;;  %v1343_v26 = vmul.f32 -1.442695, %v932_v18 }
 0x1f8   : > { %v1623_v24 = vpop.eup %1622  ;;  %v1077_v25 = vadd.f32 1.0, %v1621_v21  ;;  %1642 = vpow2.f32 %v1344_v20  ;;  %v947_v27 = vadd.f32 %v1525_v23, %v1891_v11  ;;  %v941_v28 = vpop.f32.mrb[29].mxu1 }
 0x1f9   : > { %v1625_v29 = vpop.eup %1624  ;;  %1644 = vrcp.f32 %v1074_v22  ;;  %v1076_v30 = vadd.f32 1.0, %v1623_v24  ;;  %v942_v31 = vadd.f32 %v1891_v11, %v941_v28 }
 0x1fa   : > { %v1627_v32 = vpop.eup %1626  ;;  %1168 = vst.msk [vmem:[%s1911_s19 + $0x78] sm:$0xff] %vm1152_vm5, %v1625_v29  ;;  %1646 = vrcp.f32 %v1077_v25  ;;  %v1346_v33 = vmul.f32 -1.442695, %v947_v27 }
 0x1fb   : > { %v1629_v34 = vpop.eup %1628  ;;  %1167 = vst.msk [vmem:[%s1911_s19 + $0x70] sm:$0xff] %vm1152_vm5, %v1627_v32  ;;  %1648 = vrcp.f32 %v1076_v30  ;;  %v1528_v35 = vpop.f32.mrb[30].mxu1  ;;  %v1345_v38 = vmul.f32 -1.442695, %v942_v31 }
 0x1fc   : > { %v1631_v36 = vpop.eup %1630  ;;  %v1079_v37 = vadd.f32 1.0, %v1629_v34  ;;  %1650 = vpow2.f32 %v1343_v26  ;;  %v957_v39 = vadd.f32 %v1528_v35, %v1891_v11  ;;  %v951_v40 = vpop.f32.mrb[31].mxu1 }
 0x1fd   : > { %v1633_v42 = vpop.eup %1632  ;;  %v1078_v43 = vadd.f32 1.0, %v1631_v36  ;;  %1652 = vpow2.f32 %v1346_v33  ;;  %v952_v44 = vadd.f32 %v1891_v11, %v951_v40 }
 0x1fe   : > { %v1635_v45 = vpop.eup %1634  ;;  %1170 = vst.msk [vmem:[%s1911_s19 + $0x88] sm:$0xff] %vm1152_vm5, %v1633_v42  ;;  %1654 = vrcp.f32 %v1079_v37  ;;  %v1348_v46 = vmul.f32 -1.442695, %v957_v39 }
 0x1ff   : > { %v1637_v47 = vpop.eup %1636  ;;  %1169 = vst.msk [vmem:[%s1911_s19 + $0x80] sm:$0xff] %vm1152_vm5, %v1635_v45  ;;  %1656 = vrcp.f32 %v1078_v43  ;;  %v1347_v50 = vmul.f32 -1.442695, %v952_v44 }
 0x200   : > { %v1639_v48 = vpop.eup %1638  ;;  %v1081_v49 = vadd.f32 1.0, %v1637_v47  ;;  %1658 = vpow2.f32 %v1345_v38 }
 0x201   : > { %v1641_v51 = vpop.eup %1640  ;;  %v1080_v52 = vadd.f32 1.0, %v1639_v48  ;;  %1660 = vpow2.f32 %v1348_v46 }
 0x202   : > { %v1643_v11 = vpop.eup %1642  ;;  %1172 = vst.msk [vmem:[%s1911_s19 + $0x98] sm:$0xff] %vm1152_vm5, %v1641_v51  ;;  %1662 = vrcp.f32 %v1081_v49 }
 0x203   : > { %v1645_v53 = vpop.eup %1644  ;;  %1664 = vrcp.f32 %v1080_v52  ;;  %v1083_v54 = vadd.f32 1.0, %v1643_v11 }
 0x204   : > { %v1647_v55 = vpop.eup %1646  ;;  %1171 = vst.msk [vmem:[%s1911_s19 + $0x90] sm:$0xff] %vm1152_vm5, %v1645_v53  ;;  %1666 = vpow2.f32 %v1347_v50 }
 0x205   : > { %v1649_v56 = vpop.eup %1648  ;;  %1174 = vst.msk [vmem:[%s1911_s19 + $0xa8] sm:$0xff] %vm1152_vm5, %v1647_v55  ;;  %1668 = vrcp.f32 %v1083_v54 }
 0x206   : > { %v1651_v57 = vpop.eup %1650  ;;  %1173 = vst.msk [vmem:[%s1911_s19 + $0xa0] sm:$0xff] %vm1152_vm5, %v1649_v56 }
 0x207   : > { %v1653_v58 = vpop.eup %1652  ;;  %v1082_v59 = vadd.f32 1.0, %v1651_v57 }
 0x208   : > { %v1655_v60 = vpop.eup %1654  ;;  %v1085_v61 = vadd.f32 1.0, %v1653_v58 }
 0x209   : > { %v1657_v62 = vpop.eup %1656  ;;  %1176 = vst.msk [vmem:[%s1911_s19 + $0xb8] sm:$0xff] %vm1152_vm5, %v1655_v60  ;;  %1670 = vrcp.f32 %v1082_v59 }
 0x20a   : > { %v1659_v63 = vpop.eup %1658  ;;  %1175 = vst.msk [vmem:[%s1911_s19 + $0xb0] sm:$0xff] %vm1152_vm5, %v1657_v62  ;;  %1672 = vrcp.f32 %v1085_v61 }
 0x20b   : > { %v1661_v0 = vpop.eup %1660  ;;  %v1084_v1 = vadd.f32 1.0, %v1659_v63 }
 0x20c   : > { %v1663_v2 = vpop.eup %1662  ;;  %v1087_v3 = vadd.f32 1.0, %v1661_v0 }
 0x20d   : > { %v1665_v4 = vpop.eup %1664  ;;  %1178 = vst.msk [vmem:[%s1911_s19 + $0xc8] sm:$0xff] %vm1152_vm5, %v1663_v2  ;;  %1674 = vrcp.f32 %v1084_v1 }
 0x20e   : > { %v1667_v5 = vpop.eup %1666  ;;  %1177 = vst.msk [vmem:[%s1911_s19 + $0xc0] sm:$0xff] %vm1152_vm5, %v1665_v4  ;;  %1676 = vrcp.f32 %v1087_v3 }
 0x20f   : > { %v1669_v6 = vpop.eup %1668  ;;  %v1086_v7 = vadd.f32 1.0, %v1667_v5 }
 0x210   : > { %1180 = vst.msk [vmem:[%s1911_s19 + $0xd8] sm:$0xff] %vm1152_vm5, %v1669_v6 }
 0x211   : > { %1678 = vrcp.f32 %v1086_v7 }
 0x213   : > { %v1671_v8 = vpop.eup %1670 }
 0x214   : > { %v1673_v9 = vpop.eup %1672  ;;  %1179 = vst.msk [vmem:[%s1911_s19 + $0xd0] sm:$0xff] %vm1152_vm5, %v1671_v8 }
 0x215   : > { %1182 = vst.msk [vmem:[%s1911_s19 + $0xe8] sm:$0xff] %vm1152_vm5, %v1673_v9 }
 0x217   : > { %v1675_v10 = vpop.eup %1674 }
 0x218   : > { %v1677_v12 = vpop.eup %1676  ;;  %1181 = vst.msk [vmem:[%s1911_s19 + $0xe0] sm:$0xff] %vm1152_vm5, %v1675_v10 }
 0x219   : > { %1184 = vst.msk [vmem:[%s1911_s19 + $0xf8] sm:$0xff] %vm1152_vm5, %v1677_v12 }
 0x21b   : > { %v1679_v13 = vpop.eup %1678 }
 0x21c   : > { %1183 = vst.msk [vmem:[%s1911_s19 + $0xf0] sm:$0xff] %vm1152_vm5, %v1679_v13 }
 0x21d PF: > { %s15_s18 = sadd.s32 1, %s1686_s18  }
 0x21e   : > { %p12_p4 = scmp.ge.s32.totalorder %s15_s18, 6  }
 0x220   :  { %14 = sbr.rel (!%p12_p4) target bundleno = 1 (0x1), region = 70 }

</bundles_post_ra>
